<compile_context>
chip_gen: v7x
topology: tpu7x:2x2x1
jax: 0.10.0
libtpu: 0.0.40
codegen_flags: <defaults>
</compile_context>

<pallas_src>
import jax
import jax.numpy as jnp
from jax.experimental import pallas as pl
from jax.experimental.pallas import tpu as pltpu


def _round_up(n, m):
    return ((n + m - 1) // m) * m


def _mlp_kernel(x_ref, w1_ref, b1_ref, w2_ref, b2_ref, w3_ref, b3_ref, o_ref):
    """Fused MLP on one (15, TB) batch tile (batch on the lane axis).

    Weights are in PyTorch (out_features, in_features) layout, so each layer
    is computed as W @ x^T + b (b is an (out, 1) column broadcast over lanes).
    The kernel is HBM-bandwidth bound (~14 flops/byte), so the three tiny
    contractions just need to stay off the critical path.
    """
    x = x_ref[...]                                                  # (15, TB) f32

    # fc1 + ReLU
    h1 = jnp.dot(w1_ref[...], x, preferred_element_type=jnp.float32)
    h1 = jnp.maximum(h1 + b1_ref[...], 0.0)                         # (15, TB)

    # fc2 + ReLU
    h2 = jnp.dot(w2_ref[...], h1, preferred_element_type=jnp.float32)
    h2 = jnp.maximum(h2 + b2_ref[...], 0.0)                         # (15, TB)

    # out + Sigmoid: exp and approx reciprocal both run on the EUP slot,
    # keeping the VALU free.
    z = jnp.dot(w3_ref[...], h2, preferred_element_type=jnp.float32) + b3_ref[...]
    o_ref[...] = pl.reciprocal(1.0 + jnp.exp(-z), approx=True).astype(o_ref.dtype)


def doppler_classifier(x, params, *, batch_tile=4096):
    """x: (B, 15) float32; params: PyTorch-layout weights. Returns (B, 1) f32."""
    w1, b1 = params["w1"], params["b1"]      # (15, 15), (15, 1)
    w2, b2 = params["w2"], params["b2"]      # (15, 15), (15, 1)
    w3, b3 = params["w3"], params["b3"]      # (1, 15),  (1, 1)

    B, F = x.shape
    assert F == w1.shape[1]

    # Batch goes on the 128-lane axis.  Pad it to a multiple of the batch tile
    # (tile is a multiple of 128), so every block is full / unmasked.
    tb = min(batch_tile, _round_up(B, 128))
    b_pad = _round_up(B, tb)
    xt = jnp.pad(x.T, ((0, 0), (0, b_pad - B)))                     # (15, b_pad)

    grid = (b_pad // tb,)

    def resident_spec(shape):
        # Whole (tiny) weight array, same block for every grid step -> stays in VMEM.
        return pl.BlockSpec(shape, lambda i: (0, 0))

    # VMEM budget: 2 x (15*tb + 1*tb) * 4 B + weights  ->  < 1 MiB at tb=4096,
    # comfortably inside v7x's 64 MiB physical / 32 MiB scoped VMEM.
    out_t = pl.pallas_call(
        _mlp_kernel,
        out_shape=jax.ShapeDtypeStruct((1, b_pad), jnp.float32),
        grid=grid,
        in_specs=[
            pl.BlockSpec((F, tb), lambda i: (0, i)),                # x^T batch tile
            resident_spec(w1.shape), resident_spec(b1.shape),
            resident_spec(w2.shape), resident_spec(b2.shape),
            resident_spec(w3.shape), resident_spec(b3.shape),
        ],
        out_specs=pl.BlockSpec((1, tb), lambda i: (0, i)),          # lane-dense output
        compiler_params=pltpu.CompilerParams(
            dimension_semantics=("parallel",),   # megacore-shard the batch on v7x
            vmem_limit_bytes=16 * 1024 * 1024,
        ),
    )(xt, w1, b1, w2, b2, w3, b3)

    return out_t[:, :B].T                                           # (B, 1)


def init_params(key):
    """Deterministic init mimicking nn.Linear's U(-1/sqrt(fan_in), 1/sqrt(fan_in)).

    Weights are stored in PyTorch layout (out_features, in_features); biases as
    (out_features, 1) columns so they broadcast over the lane (batch) axis.
    """
    ks = jax.random.split(key, 6)

    def linear(kw, kb, fan_in, fan_out):
        bound = 1.0 / jnp.sqrt(jnp.float32(fan_in))
        w = jax.random.uniform(kw, (fan_out, fan_in), jnp.float32, -bound, bound)
        b = jax.random.uniform(kb, (fan_out, 1), jnp.float32, -bound, bound)
        return w, b

    w1, b1 = linear(ks[0], ks[1], 15, 15)
    w2, b2 = linear(ks[2], ks[3], 15, 15)
    w3, b3 = linear(ks[4], ks[5], 15, 1)
    return {"w1": w1, "b1": b1, "w2": w2, "b2": b2, "w3": w3, "b3": b3}


def _reference(x, params):
    # Plain-JAX reference in the original (B, F) layout / PyTorch semantics.
    h1 = jnp.maximum(x @ params["w1"].T + params["b1"].T, 0.0)
    h2 = jnp.maximum(h1 @ params["w2"].T + params["b2"].T, 0.0)
    return jax.nn.sigmoid(h2 @ params["w3"].T + params["b3"].T)


if __name__ == "__main__":
    key = jax.random.PRNGKey(0)
    k_x, k_x2, k_p = jax.random.split(key, 3)

    params = init_params(k_p)

    # Small case (single padded batch tile).
    B = 8
    x = jax.random.normal(k_x, (B, 15), dtype=jnp.float32)
    out = jax.block_until_ready(doppler_classifier(x, params))
    ref = _reference(x, params)
    assert out.shape == (B, 1)
    assert jnp.allclose(out, ref, atol=2e-3, rtol=2e-3)

    # Ragged, multi-tile case: exercises the batch grid and tail padding.
    B2 = 300
    x2 = jax.random.normal(k_x2, (B2, 15), dtype=jnp.float32)
    out2 = jax.block_until_ready(doppler_classifier(x2, params, batch_tile=128))
    ref2 = _reference(x2, params)
    assert out2.shape == (B2, 1)
    assert jnp.allclose(out2, ref2, atol=2e-3, rtol=2e-3)

    print("KERNEL_OK")
</pallas_src>

<mosaic_0001>
module attributes {stable_mosaic.version = 11 : i64} {
  func.func @_mlp_kernel(%arg0: i32, %arg1: memref<15x128xf32, #tpu.memory_space<vmem>>, %arg2: memref<15x15xf32, #tpu.memory_space<vmem>>, %arg3: memref<15x1xf32, #tpu.memory_space<vmem>>, %arg4: memref<15x15xf32, #tpu.memory_space<vmem>>, %arg5: memref<15x1xf32, #tpu.memory_space<vmem>>, %arg6: memref<1x15xf32, #tpu.memory_space<vmem>>, %arg7: memref<1x1xf32, #tpu.memory_space<vmem>>, %arg8: memref<1x128xf32, #tpu.memory_space<vmem>>) attributes {dimension_semantics = [#tpu.dimension_semantics<parallel>], iteration_bounds = array<i64: 1>, scalar_prefetch = 0 : i64, scratch_operands = 0 : i64, tpu.core_type = #tpu.core_type<tc>, window_params = [{transform_indices = @transform_0, window_bounds = array<i64: 15, 128>}, {pipeline_mode = #tpu.pipeline_mode<synchronous>, transform_indices = @transform_1, window_bounds = array<i64: 15, 15>}, {pipeline_mode = #tpu.pipeline_mode<synchronous>, transform_indices = @transform_2, window_bounds = array<i64: 15, 1>}, {pipeline_mode = #tpu.pipeline_mode<synchronous>, transform_indices = @transform_3, window_bounds = array<i64: 15, 15>}, {pipeline_mode = #tpu.pipeline_mode<synchronous>, transform_indices = @transform_4, window_bounds = array<i64: 15, 1>}, {pipeline_mode = #tpu.pipeline_mode<synchronous>, transform_indices = @transform_5, window_bounds = array<i64: 1, 15>}, {pipeline_mode = #tpu.pipeline_mode<synchronous>, transform_indices = @transform_6, window_bounds = array<i64: 1, 1>}, {transform_indices = @transform_7, window_bounds = array<i64: 1, 128>}]} {
    %c0 = arith.constant 0 : index
    %c0_0 = arith.constant 0 : index
    %0 = vector.load %arg1[%c0, %c0_0] : memref<15x128xf32, #tpu.memory_space<vmem>>, vector<15x128xf32>
    %c0_1 = arith.constant 0 : index
    %c0_2 = arith.constant 0 : index
    %1 = vector.load %arg2[%c0_1, %c0_2] : memref<15x15xf32, #tpu.memory_space<vmem>>, vector<15x15xf32>
    %cst = arith.constant dense<0.000000e+00> : vector<15x128xf32>
    %2 = tpu.matmul %1, %0, %cst {dimension_numbers = #tpu.dot_dimension_numbers<[1], [0], [0], [1], [0, 0, 1, 1], [], []>} : vector<15x15xf32>, vector<15x128xf32>, vector<15x128xf32> -> vector<15x128xf32>
    %c0_3 = arith.constant 0 : index
    %c0_4 = arith.constant 0 : index
    %3 = vector.load %arg3[%c0_3, %c0_4] : memref<15x1xf32, #tpu.memory_space<vmem>>, vector<15x1xf32>
    %4 = vector.broadcast %3 : vector<15x1xf32> to vector<15x128xf32>
    %5 = arith.addf %2, %4 : vector<15x128xf32>
    %cst_5 = arith.constant 0.000000e+00 : f32
    %6 = vector.broadcast %cst_5 : f32 to vector<15x128xf32>
    %7 = arith.maximumf %5, %6 : vector<15x128xf32>
    %c0_6 = arith.constant 0 : index
    %c0_7 = arith.constant 0 : index
    %8 = vector.load %arg4[%c0_6, %c0_7] : memref<15x15xf32, #tpu.memory_space<vmem>>, vector<15x15xf32>
    %cst_8 = arith.constant dense<0.000000e+00> : vector<15x128xf32>
    %9 = tpu.matmul %8, %7, %cst_8 {dimension_numbers = #tpu.dot_dimension_numbers<[1], [0], [0], [1], [0, 0, 1, 1], [], []>} : vector<15x15xf32>, vector<15x128xf32>, vector<15x128xf32> -> vector<15x128xf32>
    %c0_9 = arith.constant 0 : index
    %c0_10 = arith.constant 0 : index
    %10 = vector.load %arg5[%c0_9, %c0_10] : memref<15x1xf32, #tpu.memory_space<vmem>>, vector<15x1xf32>
    %11 = vector.broadcast %10 : vector<15x1xf32> to vector<15x128xf32>
    %12 = arith.addf %9, %11 : vector<15x128xf32>
    %cst_11 = arith.constant 0.000000e+00 : f32
    %13 = vector.broadcast %cst_11 : f32 to vector<15x128xf32>
    %14 = arith.maximumf %12, %13 : vector<15x128xf32>
    %c0_12 = arith.constant 0 : index
    %c0_13 = arith.constant 0 : index
    %15 = vector.load %arg6[%c0_12, %c0_13] : memref<1x15xf32, #tpu.memory_space<vmem>>, vector<1x15xf32>
    %cst_14 = arith.constant dense<0.000000e+00> : vector<1x128xf32>
    %16 = tpu.matmul %15, %14, %cst_14 {dimension_numbers = #tpu.dot_dimension_numbers<[1], [0], [0], [1], [0, 0, 1, 1], [], []>} : vector<1x15xf32>, vector<15x128xf32>, vector<1x128xf32> -> vector<1x128xf32>
    %c0_15 = arith.constant 0 : index
    %c0_16 = arith.constant 0 : index
    %17 = vector.load %arg7[%c0_15, %c0_16] : memref<1x1xf32, #tpu.memory_space<vmem>>, vector<1x1xf32>
    %18 = vector.broadcast %17 : vector<1x1xf32> to vector<1x128xf32>
    %19 = arith.addf %16, %18 : vector<1x128xf32>
    %cst_17 = arith.constant 0.000000e+00 : f32
    %20 = vector.broadcast %cst_17 : f32 to vector<1x128xf32>
    %21 = arith.subf %20, %19 : vector<1x128xf32>
    %22 = math.exp %21 : vector<1x128xf32>
    %cst_18 = arith.constant 1.000000e+00 : f32
    %23 = vector.broadcast %cst_18 : f32 to vector<1x128xf32>
    %24 = arith.addf %23, %22 : vector<1x128xf32>
    %25 = tpu.reciprocal %24 {approx = true} : vector<1x128xf32> -> vector<1x128xf32>
    %c0_19 = arith.constant 0 : index
    %c0_20 = arith.constant 0 : index
    %26 = vector.load %arg8[%c0_19, %c0_20] : memref<1x128xf32, #tpu.memory_space<vmem>>, vector<1x128xf32>
    tpu.vector_store %arg8[%c0_19, %c0_20], %25 {strides = array<i32>} : memref<1x128xf32, #tpu.memory_space<vmem>>, vector<1x128xf32>,
    return
  }
  func.func @transform_0(%arg0: i32) -> (i32, i32) {
    %c0_i32 = arith.constant 0 : i32
    %c0_i32_0 = arith.constant 0 : i32
    return %c0_i32, %arg0 : i32, i32
  }
  func.func @transform_1(%arg0: i32) -> (i32, i32) {
    %c0_i32 = arith.constant 0 : i32
    %c0_i32_0 = arith.constant 0 : i32
    %c0_i32_1 = arith.constant 0 : i32
    return %c0_i32, %c0_i32_0 : i32, i32
  }
  func.func @transform_2(%arg0: i32) -> (i32, i32) {
    %c0_i32 = arith.constant 0 : i32
    %c0_i32_0 = arith.constant 0 : i32
    %c0_i32_1 = arith.constant 0 : i32
    return %c0_i32, %c0_i32_0 : i32, i32
  }
  func.func @transform_3(%arg0: i32) -> (i32, i32) {
    %c0_i32 = arith.constant 0 : i32
    %c0_i32_0 = arith.constant 0 : i32
    %c0_i32_1 = arith.constant 0 : i32
    return %c0_i32, %c0_i32_0 : i32, i32
  }
  func.func @transform_4(%arg0: i32) -> (i32, i32) {
    %c0_i32 = arith.constant 0 : i32
    %c0_i32_0 = arith.constant 0 : i32
    %c0_i32_1 = arith.constant 0 : i32
    return %c0_i32, %c0_i32_0 : i32, i32
  }
  func.func @transform_5(%arg0: i32) -> (i32, i32) {
    %c0_i32 = arith.constant 0 : i32
    %c0_i32_0 = arith.constant 0 : i32
    %c0_i32_1 = arith.constant 0 : i32
    return %c0_i32, %c0_i32_0 : i32, i32
  }
  func.func @transform_6(%arg0: i32) -> (i32, i32) {
    %c0_i32 = arith.constant 0 : i32
    %c0_i32_0 = arith.constant 0 : i32
    %c0_i32_1 = arith.constant 0 : i32
    return %c0_i32, %c0_i32_0 : i32, i32
  }
  func.func @transform_7(%arg0: i32) -> (i32, i32) {
    %c0_i32 = arith.constant 0 : i32
    %c0_i32_0 = arith.constant 0 : i32
    return %c0_i32, %arg0 : i32, i32
  }
}

</mosaic_0001>

<bundles_post_ra>
// kernel: tpu_custom_call.1
= control target key start
LH: loop header
LB: loop body
LE: loop exit
PB: predicated region body
PF: predicated region fallthrough
CT: control target
= control target key end

     0   :  { %s545_s0 = inlined_call_operand.vmem [shape: f32[15,128], index: 0, kind: input, shape index: {}]   ;;  %s546_s1 = inlined_call_operand.vmem [shape: f32[15,15], index: 1, kind: input, shape index: {}]   ;;  %s547_s2 = inlined_call_operand.vmem [shape: f32[15,1], index: 2, kind: input, shape index: {}]   ;;  %s548_s3 = inlined_call_operand.vmem [shape: f32[15,15], index: 3, kind: input, shape index: {}]   ;;  %s549_s4 = inlined_call_operand.vmem [shape: f32[15,1], index: 4, kind: input, shape index: {}]   ;;  %s550_s5 = inlined_call_operand.vmem [shape: f32[1,15], index: 5, kind: input, shape index: {}]   ;;  %s551_s6 = inlined_call_operand.<no memory space> [shape: f32[1,1], index: 6, kind: input, shape index: {}]   ;;  %s552_s7 = inlined_call_operand.hbm [shape: f32[1,128], index: 7, kind: output, shape index: {}]  }
   0x1   :  { %v12_v0 = vstv %s551_s6 }
   0x2   :  { %13 = vst [vmem:[#allocation2] sm:$0x1] %v12_v0 }
   0x3   :  { %v29_v1 = vld [vmem:[%s545_s0] sm:$0xff]  ;;  %v30_v2 = vld [vmem:[%s545_s0 + $0x8] sm:$0x7f]  ;;  %vm52_vm0 = vcmask 1046528   ;;  %vm432_vm1 = vmmov 1   ;;  %vm45_vm3 = vcmask 121856  }
   0x4   :  { %v31_v3 = vld [vmem:[%s546_s1] sm:$0xff]  ;;  %v380_v4 = vpack.c.bf16 %v30_v2, %v29_v1  ;;  %vm490_vm2 = vmpackc.low %vm52_vm0, %vm432_vm1  ;;  %v433_v7 = vmov 0  }
   0x5   :  { %v33_v6 = vld [vmem:[%s547_s2] sm:$0xff]  ;;  %363 = vmatprep.mubr.msk.f32.mxu0 %vm45_vm3, %v31_v3  ;;  %402 = vset.pattern.permute.xlu0 %v433_v7 }
   0x6   :  { %14 = vsyncpa [#allocation4], 0  ;;  %382 = vmatprep.subr.msk.bf16.mxu0 %vm490_vm2, %v380_v4  ;;  %37 = vperm.xlu0 %402, %v33_v6   ;;  %v32_v8 = vld [vmem:[%s546_s1 + $0x8] sm:$0x7f]  ;;  %v133_v11 = vld [vmem:[%s548_s3] sm:$0xff]  ;;  %v434_v24 = vmov 0.0|0.0   ;;  %v240_v36 = vlaneseq }
   0x7   :  { %385 = vmatpush3.bf16.msk.msra.mxu0 %vm490_vm2, %v380_v4  ;;  %v34_v9 = vld [vmem:[%s547_s2 + $0x8] sm:$0x7f]  ;;  %403 = vset.pattern.permute.xlu1 %v433_v7  ;;  %v135_v12 = vld [vmem:[%s549_s4] sm:$0xff]  ;;  %vm435_vm4 = vmmov 0   ;;  %v436_v25 = vmov 0.0   ;;  %s437_s19 = smov [#allocation3]  }
   0x8   :  { %370 = vmatprep.mubr.msk.f32.mxu1 %vm45_vm3, %v133_v11  ;;  %139 = vperm.xlu1 %403, %v135_v12   ;;  %v136_v13 = vld [vmem:[%s549_s4 + $0x8] sm:$0x7f]  ;;  %v233_v35 = vld [vmem:[%s550_s5] sm:$0x1]  ;;  %v241_v37 = vshrl.u32 %v240_v36, 7  ;;  %s332_s20 = sshll.u32 %s437_s19, 4  ;;  %s333_s20 = int_to_ptr.vmem [resolvable:$true] %s332_s20 }
   0x9   :  { %v234_v10 = vld [vmem:[#allocation2] sm:$0x1]  ;;  %v134_v23 = vld [vmem:[%s548_s3 + $0x8] sm:$0x7f]  ;;  %392 = vmatprep.subr.bf16.mxu0 %v434_v24  ;;  %s408_s5 = scalar_lea.vmem %s333_s20, 16  ;;  %s412_s21 = scalar_lea.vmem %s333_s20, 32 }
   0xa   :  { %364 = vmatmul.mubr.msk.f32.vlgmr.msra.gmra.mrb[0].mxu0 %vm45_vm3, %v32_v8  ;;  %42 = vperm.xlu0 %402, %v34_v9   ;;  %v242_v38 = vsub.s32 0, %v241_v37  ;;  %p409_p0 = scmp.ne.s32.totalorder %s333_s20, %s408_s5  ;;  %p413_p1 = scmp.lt.s32.totalorder %s333_s20, %s333_s20 }
   0xb   :  { %377 = vmatprep.mubr.msk.f32.mxu0 %vm435_vm4, %v436_v25  ;;  %p414_p2 = scmp.lt.s32.totalorder %s412_s21, %s408_s5 }
   0xc   :  { %144 = vperm.xlu1 %403, %v136_v13  }
   0xd   :  { %p415_p3 = por %p414_p2, %p413_p1 }
   0xe   :  { %237 = vperm.xlu0 %402, %v234_v10  }
   0xf   :  { %p416_p4 = pnand %p415_p3, %p409_p0 }
  0x85   :  { %v38_v14 = vpop.permute.xlu0 %37 }
  0x87   :  { %v140_v26 = vpop.permute.xlu1 %139 }
  0x89   :  { %v43_v15 = vpop.permute.xlu0 %42 }
  0x8b   :  { %v145_v27 = vpop.permute.xlu1 %144 }
  0x8d   :  { %v238_v39 = vpop.permute.xlu0 %237 }
  0x8e   :  { %v243_v40 = vrot.slane %v238_v39, %v242_v38 }
  0xdd   :  { %v365_v16 = vpop.f32.mrb[0].mxu0 }
  0xde   :  { %v128_v17 = vadd.f32 %v365_v16, %v43_v15  ;;  %v122_v18 = vpop.f32.mrb[1].mxu0 }
  0xdf   :  { %v123_v19 = vadd.f32 %v122_v18, %v38_v14 }
  0xe0   :  { %v132_v20 = vmax.f32 %v128_v17, 0.0 }
  0xe1   :  { %v131_v21 = vmax.f32 %v123_v19, 0.0 }
  0xe3   :  { %v386_v22 = vpack.c.bf16 %v132_v20, %v131_v21 }
  0xe5   :  { %388 = vmatprep.subr.msk.bf16.mxu1 %vm490_vm2, %v386_v22 }
  0xe6   :  { %391 = vmatpush3.bf16.msk.msra.mxu1 %vm490_vm2, %v386_v22 }
  0xe9   :  { %371 = vmatmul.mubr.msk.f32.vlgmr.msra.gmra.mrb[0].mxu1 %vm45_vm3, %v134_v23 }
 0x1bc   :  { %v372_v28 = vpop.f32.mrb[0].mxu1 }
 0x1bd   :  { %v228_v29 = vadd.f32 %v372_v28, %v145_v27  ;;  %v222_v30 = vpop.f32.mrb[1].mxu1 }
 0x1be   :  { %v223_v31 = vadd.f32 %v222_v30, %v140_v26 }
 0x1bf   :  { %v232_v32 = vmax.f32 %v228_v29, 0.0 }
 0x1c0   :  { %v231_v33 = vmax.f32 %v223_v31, 0.0 }
 0x1c2   :  { %v393_v34 = vpack.c.bf16 %v232_v32, %v231_v33 }
 0x1c4   :  { %395 = vmatpush3.bf16.msk.msra.mxu0 %vm490_vm2, %v393_v34 }
 0x1c7   :  { %378 = vmatmul.mubr.msk.f32.vlgmr.msra.gmra.mrb[2].mxu0 %vm45_vm3, %v233_v35 }
 0x29a   :  { %v316_v41 = vpop.f32.mrb[2].mxu0 }
 0x29b   :  { %v317_v42 = vadd.f32 %v316_v41, %v243_v40  ;;  %v379_v43 = vpop.f32.mrb[3].mxu0 }
 0x29d   :  { %v320_v44 = vsub.f32 0.0, %v317_v42 }
 0x29f   :  { %v321_v45 = vmul.f32 1.442695, %v320_v44 }
 0x2a1   :  { %404 = vpow2.f32 %v321_v45 }
 0x2ab   :  { %v405_v46 = vpop.eup %404 }
 0x2ac   :  { %v323_v47 = vadd.f32 1.0, %v405_v46 }
 0x2ae   :  { %406 = vrcp.f32 %v323_v47 }
 0x2b8   :  { %v407_v48 = vpop.eup %406 }
 0x2b9   :  { %325 = vst [vmem:[#allocation3] sm:$0x1] %v407_v48 }
 0x2ba   :  { %419 = shalt.err (!%p416_p4)
}
 0x2bb   :  { %s420_s24 = scalar_lea.hbm %s552_s7, 16 }
 0x2bc   :  { %p421_p5 = scmp.ne.s32.totalorder %s552_s7, %s420_s24  ;;  %p424_p6 = scmp.lt.u32.totalorder %s420_s24, %s552_s7 }
 0x2be   :  { %p426_p7 = pnand %p424_p6, %p421_p5 }
 0x2c0   :  { %429 = shalt.err (!%p426_p7)
}
 0x2c1   :  { %335 = dma.vmem_to_hbm [thread:$0]  %s333_s20, 16, %s552_s7, [#allocation4]  }
 0x2c2   :  { %430 = dma.done.wait [#allocation4], 16  }
 0x2c3   :  { %431 = vsyncadd [#allocation4], 4294967280 }
 0x2c4   :  { %339 = vsyncpa [#allocation4], 1 }

</bundles_post_ra>
